<compile_context>
chip_gen: v7x
topology: tpu7x:2x2x1
jax: 0.10.0
libtpu: 0.0.40
codegen_flags: <defaults>
</compile_context>

<pallas_src>
import jax
import jax.numpy as jnp
from jax.experimental import pallas as pl
from jax.experimental.pallas import tpu as pltpu


def _round_up(x, m):
    return (x + m - 1) // m * m


def _cdiv(a, b):
    return (a + b - 1) // b


def _const_spec(shape):
    """Full-extent, grid-constant block; single-buffered when supported."""
    try:
        return pl.BlockSpec(shape, lambda b: (0, 0),
                            pipeline_mode=pl.Buffered(buffer_count=1))
    except TypeError:  # older BlockSpec signature without pipeline_mode
        return pl.BlockSpec(shape, lambda b: (0, 0))


# ---------------------------------------------------------------------------
# Kernels (all matmuls accumulate in f32; bias/ReLU epilogue stays f32 — v5e safe)
# ---------------------------------------------------------------------------
def _hin2_kernel(xu_ref, xi_ref,
                 uw0_ref, ub0_ref, uw1_ref, ub1_ref,
                 iw0_ref, ib0_ref, iw1_ref, ib1_ref,
                 ou_ref, oi_ref):
    """nlayer==2: out = relu(x @ W0 + b0) @ W1 + b1, for both branches."""
    # u branch
    hu = jnp.dot(xu_ref[...], uw0_ref[...], preferred_element_type=jnp.float32)
    hu = jnp.maximum(hu + ub0_ref[...].astype(jnp.float32), 0.0)
    ou = jnp.dot(hu.astype(uw1_ref.dtype), uw1_ref[...],
                 preferred_element_type=jnp.float32)
    ou_ref[...] = (ou + ub1_ref[...].astype(jnp.float32)).astype(ou_ref.dtype)
    # i branch
    hi = jnp.dot(xi_ref[...], iw0_ref[...], preferred_element_type=jnp.float32)
    hi = jnp.maximum(hi + ib0_ref[...].astype(jnp.float32), 0.0)
    oi = jnp.dot(hi.astype(iw1_ref.dtype), iw1_ref[...],
                 preferred_element_type=jnp.float32)
    oi_ref[...] = (oi + ib1_ref[...].astype(jnp.float32)).astype(oi_ref.dtype)


def _hin1_kernel(xu_ref, xi_ref,
                 uw0_ref, ub0_ref, iw0_ref, ib0_ref,
                 ou_ref, oi_ref):
    """nlayer==1: out = relu(x @ W0 + b0), for both branches."""
    H = ou_ref.shape[1]
    hu = jnp.dot(xu_ref[...], uw0_ref[...], preferred_element_type=jnp.float32)
    hu = jnp.maximum(hu + ub0_ref[...].astype(jnp.float32), 0.0)
    ou_ref[...] = hu[:, :H].astype(ou_ref.dtype)
    hi = jnp.dot(xi_ref[...], iw0_ref[...], preferred_element_type=jnp.float32)
    hi = jnp.maximum(hi + ib0_ref[...].astype(jnp.float32), 0.0)
    oi_ref[...] = hi[:, :H].astype(oi_ref.dtype)


# ---------------------------------------------------------------------------
# Parameter init (mimics nn.Linear default: U(-1/sqrt(in), 1/sqrt(in)))
# Weights are stored already transposed to [in_features, out_features].
# ---------------------------------------------------------------------------
def _linear_params(key, in_f, out_f, dtype):
    kw, kb = jax.random.split(key)
    bound = 1.0 / (float(in_f) ** 0.5)
    w = jax.random.uniform(kw, (in_f, out_f), dtype, minval=-bound, maxval=bound)
    b = jax.random.uniform(kb, (out_f,), dtype, minval=-bound, maxval=bound)
    return w, b


class HIN:
    """JAX/Pallas port of NeuACF HIN (nlayer in {1, 2})."""

    def __init__(self, nlayer, u_feature_num, i_feature_num, hidden_size,
                 last_layer_size, key, param_dtype=jnp.float32,
                 max_batch_tile=512):
        assert nlayer in (1, 2), "only nlayer in {1,2} is well-defined in the reference"
        assert max_batch_tile % 8 == 0, "batch tile must be a multiple of 8 sublanes"
        self.nlayer = nlayer
        self.param_dtype = param_dtype
        self.max_batch_tile = max_batch_tile
        self.F_u, self.F_i = u_feature_num, i_feature_num
        self.H, self.L = hidden_size, last_layer_size
        self.Hp = _round_up(hidden_size, 128)  # hidden lanes padded once, at init

        ks = jax.random.split(key, 4)
        # Unpadded parameters — also used by the pure-JAX reference.
        self.u_w0, self.u_b0 = _linear_params(ks[0], u_feature_num, hidden_size, param_dtype)
        self.u_w1, self.u_b1 = _linear_params(ks[1], hidden_size, last_layer_size, param_dtype)
        self.i_w0, self.i_b0 = _linear_params(ks[2], i_feature_num, hidden_size, param_dtype)
        self.i_w1, self.i_b1 = _linear_params(ks[3], hidden_size, last_layer_size, param_dtype)

        # Kernel layout, built ONCE at init (never per call):
        #  * W0 columns / b0 lanes padded to Hp (keeps the hidden intermediate
        #    on clean (8,128) tiles; padded hidden cols stay exactly 0 through ReLU),
        #  * W1 rows padded to Hp (matching), output lanes left UNPADDED,
        #  * feature (row) dim of W0 left UNPADDED so inputs need no feature pad.
        hpad = self.Hp - self.H
        self._uw0 = jnp.pad(self.u_w0, ((0, 0), (0, hpad)))
        self._ub0 = jnp.pad(self.u_b0.reshape(1, -1), ((0, 0), (0, hpad)))
        self._uw1 = jnp.pad(self.u_w1, ((0, hpad), (0, 0)))
        self._ub1 = self.u_b1.reshape(1, -1)
        self._iw0 = jnp.pad(self.i_w0, ((0, 0), (0, hpad)))
        self._ib0 = jnp.pad(self.i_b0.reshape(1, -1), ((0, 0), (0, hpad)))
        self._iw1 = jnp.pad(self.i_w1, ((0, hpad), (0, 0)))
        self._ib1 = self.i_b1.reshape(1, -1)

    def __call__(self, u_embedding, i_embedding):
        B = u_embedding.shape[0]
        dt = self.param_dtype
        in_item = jnp.dtype(dt).itemsize
        out_dim = self.L if self.nlayer == 2 else self.H

        if self.nlayer == 1:
            kernel = _hin1_kernel
            weight_args = (self._uw0, self._ub0, self._iw0, self._ib0)
            flops_per_row = 2 * (self.F_u + self.F_i) * self.Hp
        else:
            kernel = _hin2_kernel
            weight_args = (self._uw0, self._ub0, self._uw1, self._ub1,
                           self._iw0, self._ib0, self._iw1, self._ib1)
            flops_per_row = 2 * ((self.F_u + self.F_i) * self.Hp + 2 * self.Hp * self.L)

        weight_bytes = sum(int(w.size) * w.dtype.itemsize for w in weight_args)

        # ---- batch tile from an explicit VMEM budget (v7x has only 64 MiB) ----
        try:
            vmem_cap = int(pltpu.get_tpu_info().vmem_capacity_bytes)
        except Exception:
            vmem_cap = 64 * 1024 * 1024  # conservative (v7x per-TC)
        # Per-row VMEM: double-buffered input tiles (both branches),
        # double-buffered output tiles, f32 hidden intermediates (both branches).
        row_bytes = (2 * (self.F_u + self.F_i) * in_item
                     + 2 * 2 * out_dim * 4
                     + 2 * self.Hp * 4)
        budget = int(0.6 * vmem_cap)
        avail = budget - weight_bytes
        if avail < 8 * row_bytes:
            # TODO(synk): K-tiling over the feature axis needed when resident
            # weights alone blow the VMEM budget; fall back to smallest tile.
            tb_budget = 8
        else:
            tb_budget = (avail // row_bytes) // 8 * 8
        tb_cap = max(8, min(tb_budget, self.max_batch_tile))

        n_tiles = _cdiv(B, tb_cap)
        if B >= 16:
            n_tiles = max(n_tiles, 2)  # >=2 grid steps so v7x's 2nd TC is used
        TB = max(8, _round_up(_cdiv(B, n_tiles), 8))  # balanced -> minimal over-pad
        n_tiles = _cdiv(B, TB)
        Bp = TB * n_tiles

        # No feature-axis padding: feature dims go in at full array extent.
        xu = u_embedding.astype(dt)
        xi = i_embedding.astype(dt)
        if Bp != B:  # pad batch only, and only when needed
            xu = jnp.pad(xu, ((0, Bp - B), (0, 0)))
            xi = jnp.pad(xi, ((0, Bp - B), (0, 0)))

        in_specs = [
            pl.BlockSpec((TB, self.F_u), lambda b: (b, 0)),
            pl.BlockSpec((TB, self.F_i), lambda b: (b, 0)),
        ] + [_const_spec(w.shape) for w in weight_args]

        out_specs = (
            pl.BlockSpec((TB, out_dim), lambda b: (b, 0)),
            pl.BlockSpec((TB, out_dim), lambda b: (b, 0)),
        )
        out_shape = (
            jax.ShapeDtypeStruct((Bp, out_dim), jnp.float32),
            jax.ShapeDtypeStruct((Bp, out_dim), jnp.float32),
        )

        bytes_accessed = (in_item * Bp * (self.F_u + self.F_i)
                          + weight_bytes + 4 * 2 * Bp * out_dim)
        vmem_need = 2 * weight_bytes + TB * row_bytes + (4 << 20)
        vmem_limit = int(min(0.9 * vmem_cap, max(vmem_need, 32 << 20)))

        ou, oi = pl.pallas_call(
            kernel,
            out_shape=out_shape,
            grid_spec=pltpu.PrefetchScalarGridSpec(
                num_scalar_prefetch=0,
                grid=(n_tiles,),
                in_specs=in_specs,
                out_specs=out_specs,
            ),
            compiler_params=pltpu.CompilerParams(
                dimension_semantics=("parallel",),
                vmem_limit_bytes=vmem_limit,
            ),
            cost_estimate=pl.CostEstimate(
                flops=int(flops_per_row * Bp), transcendentals=0,
                bytes_accessed=int(bytes_accessed)),
        )(xu, xi, *weight_args)

        if Bp != B:  # strip batch padding only (outputs are lane-unpadded already)
            ou, oi = ou[:B], oi[:B]
        return ou, oi


def _reference(model, u, i):
    """Pure-JAX reference (same operand dtypes / f32 accumulation as the kernel)."""
    dt = model.param_dtype
    u = u.astype(dt)
    i = i.astype(dt)
    hu = jnp.maximum(jnp.dot(u, model.u_w0, preferred_element_type=jnp.float32)
                     + model.u_b0.astype(jnp.float32), 0.0)
    hv = jnp.maximum(jnp.dot(i, model.i_w0, preferred_element_type=jnp.float32)
                     + model.i_b0.astype(jnp.float32), 0.0)
    if model.nlayer == 1:
        return hu, hv
    ou = (jnp.dot(hu.astype(dt), model.u_w1, preferred_element_type=jnp.float32)
          + model.u_b1.astype(jnp.float32))
    ov = (jnp.dot(hv.astype(dt), model.i_w1, preferred_element_type=jnp.float32)
          + model.i_b1.astype(jnp.float32))
    return ou, ov


if __name__ == "__main__":
    key = jax.random.PRNGKey(0)
    k_params, k_u, k_i, k_u2, k_i2 = jax.random.split(key, 5)

    batch = 8
    u_feature_num = 32
    i_feature_num = 48
    hidden_size = 32
    last_layer_size = 16

    u_embedding = jax.random.normal(k_u, (batch, u_feature_num), jnp.float32)
    i_embedding = jax.random.normal(k_i, (batch, i_feature_num), jnp.float32)

    # --- nlayer==2, f32 path (strict correctness check) ---
    model = HIN(nlayer=2, u_feature_num=u_feature_num, i_feature_num=i_feature_num,
                hidden_size=hidden_size, last_layer_size=last_layer_size, key=k_params)
    net_u, net_v = jax.jit(model.__call__)(u_embedding, i_embedding)
    net_u = jax.block_until_ready(net_u)
    net_v = jax.block_until_ready(net_v)
    ref_u, ref_v = _reference(model, u_embedding, i_embedding)
    assert net_u.shape == (batch, last_layer_size)
    assert net_v.shape == (batch, last_layer_size)
    assert jnp.allclose(net_u, ref_u, atol=1e-5, rtol=1e-5)
    assert jnp.allclose(net_v, ref_v, atol=1e-5, rtol=1e-5)

    # --- batch not a multiple of 8: exercises the batch-pad / slice path ---
    b2 = 13
    u2 = jax.random.normal(k_u2, (b2, u_feature_num), jnp.float32)
    i2 = jax.random.normal(k_i2, (b2, i_feature_num), jnp.float32)
    o_u, o_v = jax.jit(model.__call__)(u2, i2)
    o_u = jax.block_until_ready(o_u)
    o_v = jax.block_until_ready(o_v)
    r_u, r_v = _reference(model, u2, i2)
    assert o_u.shape == (b2, last_layer_size) and o_v.shape == (b2, last_layer_size)
    assert jnp.allclose(o_u, r_u, atol=1e-5, rtol=1e-5)
    assert jnp.allclose(o_v, r_v, atol=1e-5, rtol=1e-5)

    # --- nlayer==1 dedicated kernel path ---
    model1 = HIN(nlayer=1, u_feature_num=u_feature_num, i_feature_num=i_feature_num,
                 hidden_size=hidden_size, last_layer_size=last_layer_size, key=k_params)
    n1_u, n1_v = jax.jit(model1.__call__)(u_embedding, i_embedding)
    n1_u = jax.block_until_ready(n1_u)
    n1_v = jax.block_until_ready(n1_v)
    r1_u, r1_v = _reference(model1, u_embedding, i_embedding)
    assert n1_u.shape == (batch, hidden_size) and n1_v.shape == (batch, hidden_size)
    assert jnp.allclose(n1_u, r1_u, atol=1e-5, rtol=1e-5)
    assert jnp.allclose(n1_v, r1_v, atol=1e-5, rtol=1e-5)

    # --- bf16-streamed variant (v6e/v7x bandwidth win; f32 accumulation) ---
    model_bf = HIN(nlayer=2, u_feature_num=u_feature_num, i_feature_num=i_feature_num,
                   hidden_size=hidden_size, last_layer_size=last_layer_size,
                   key=k_params, param_dtype=jnp.bfloat16)
    b_u, b_v = jax.jit(model_bf.__call__)(u_embedding, i_embedding)
    b_u = jax.block_until_ready(b_u)
    b_v = jax.block_until_ready(b_v)
    rb_u, rb_v = _reference(model_bf, u_embedding, i_embedding)
    assert jnp.allclose(b_u, rb_u, atol=1e-2, rtol=1e-2)
    assert jnp.allclose(b_v, rb_v, atol=1e-2, rtol=1e-2)

    print("KERNEL_OK")
</pallas_src>

<mosaic_0001>
module attributes {stable_mosaic.version = 11 : i64} {
  func.func @_hin2_kernel(%arg0: i32, %arg1: memref<8x32xf32, #tpu.memory_space<vmem>>, %arg2: memref<8x48xf32, #tpu.memory_space<vmem>>, %arg3: memref<32x128xf32, #tpu.memory_space<vmem>>, %arg4: memref<1x128xf32, #tpu.memory_space<vmem>>, %arg5: memref<128x16xf32, #tpu.memory_space<vmem>>, %arg6: memref<1x16xf32, #tpu.memory_space<vmem>>, %arg7: memref<48x128xf32, #tpu.memory_space<vmem>>, %arg8: memref<1x128xf32, #tpu.memory_space<vmem>>, %arg9: memref<128x16xf32, #tpu.memory_space<vmem>>, %arg10: memref<1x16xf32, #tpu.memory_space<vmem>>, %arg11: memref<8x16xf32, #tpu.memory_space<vmem>>, %arg12: memref<8x16xf32, #tpu.memory_space<vmem>>) attributes {dimension_semantics = [#tpu.dimension_semantics<parallel>], iteration_bounds = array<i64: 1>, scalar_prefetch = 0 : i64, scratch_operands = 0 : i64, tpu.core_type = #tpu.core_type<tc>, window_params = [{transform_indices = @transform_0, window_bounds = array<i64: 8, 32>}, {transform_indices = @transform_1, window_bounds = array<i64: 8, 48>}, {pipeline_mode = #tpu.pipeline_mode<synchronous>, transform_indices = @transform_2, window_bounds = array<i64: 32, 128>}, {pipeline_mode = #tpu.pipeline_mode<synchronous>, transform_indices = @transform_3, window_bounds = array<i64: 1, 128>}, {pipeline_mode = #tpu.pipeline_mode<synchronous>, transform_indices = @transform_4, window_bounds = array<i64: 128, 16>}, {pipeline_mode = #tpu.pipeline_mode<synchronous>, transform_indices = @transform_5, window_bounds = array<i64: 1, 16>}, {pipeline_mode = #tpu.pipeline_mode<synchronous>, transform_indices = @transform_6, window_bounds = array<i64: 48, 128>}, {pipeline_mode = #tpu.pipeline_mode<synchronous>, transform_indices = @transform_7, window_bounds = array<i64: 1, 128>}, {pipeline_mode = #tpu.pipeline_mode<synchronous>, transform_indices = @transform_8, window_bounds = array<i64: 128, 16>}, {pipeline_mode = #tpu.pipeline_mode<synchronous>, transform_indices = @transform_9, window_bounds = array<i64: 1, 16>}, {transform_indices = @transform_10, window_bounds = array<i64: 8, 16>}, {transform_indices = @transform_11, window_bounds = array<i64: 8, 16>}]} {
    %c0 = arith.constant 0 : index
    %c0_0 = arith.constant 0 : index
    %0 = vector.load %arg1[%c0, %c0_0] : memref<8x32xf32, #tpu.memory_space<vmem>>, vector<8x32xf32>
    %c0_1 = arith.constant 0 : index
    %c0_2 = arith.constant 0 : index
    %1 = vector.load %arg3[%c0_1, %c0_2] : memref<32x128xf32, #tpu.memory_space<vmem>>, vector<32x128xf32>
    %cst = arith.constant dense<0.000000e+00> : vector<8x128xf32>
    %2 = tpu.matmul %0, %1, %cst {dimension_numbers = #tpu.dot_dimension_numbers<[1], [0], [0], [1], [0, 0, 1, 1], [], []>} : vector<8x32xf32>, vector<32x128xf32>, vector<8x128xf32> -> vector<8x128xf32>
    %c0_3 = arith.constant 0 : index
    %c0_4 = arith.constant 0 : index
    %3 = vector.load %arg4[%c0_3, %c0_4] : memref<1x128xf32, #tpu.memory_space<vmem>>, vector<1x128xf32>
    %4 = vector.broadcast %3 : vector<1x128xf32> to vector<8x128xf32>
    %5 = arith.addf %2, %4 : vector<8x128xf32>
    %cst_5 = arith.constant 0.000000e+00 : f32
    %6 = vector.broadcast %cst_5 : f32 to vector<8x128xf32>
    %7 = arith.maximumf %5, %6 : vector<8x128xf32>
    %c0_6 = arith.constant 0 : index
    %c0_7 = arith.constant 0 : index
    %8 = vector.load %arg5[%c0_6, %c0_7] : memref<128x16xf32, #tpu.memory_space<vmem>>, vector<128x16xf32>
    %cst_8 = arith.constant dense<0.000000e+00> : vector<8x16xf32>
    %9 = tpu.matmul %7, %8, %cst_8 {dimension_numbers = #tpu.dot_dimension_numbers<[1], [0], [0], [1], [0, 0, 1, 1], [], []>} : vector<8x128xf32>, vector<128x16xf32>, vector<8x16xf32> -> vector<8x16xf32>
    %c0_9 = arith.constant 0 : index
    %c0_10 = arith.constant 0 : index
    %10 = vector.load %arg6[%c0_9, %c0_10] : memref<1x16xf32, #tpu.memory_space<vmem>>, vector<1x16xf32>
    %11 = vector.broadcast %10 : vector<1x16xf32> to vector<8x16xf32>
    %12 = arith.addf %9, %11 : vector<8x16xf32>
    %c0_11 = arith.constant 0 : index
    %c0_12 = arith.constant 0 : index
    %13 = vector.load %arg11[%c0_11, %c0_12] : memref<8x16xf32, #tpu.memory_space<vmem>>, vector<8x16xf32>
    tpu.vector_store %arg11[%c0_11, %c0_12], %12 {strides = array<i32>} : memref<8x16xf32, #tpu.memory_space<vmem>>, vector<8x16xf32>,
    %c0_13 = arith.constant 0 : index
    %c0_14 = arith.constant 0 : index
    %14 = vector.load %arg2[%c0_13, %c0_14] : memref<8x48xf32, #tpu.memory_space<vmem>>, vector<8x48xf32>
    %c0_15 = arith.constant 0 : index
    %c0_16 = arith.constant 0 : index
    %15 = vector.load %arg7[%c0_15, %c0_16] : memref<48x128xf32, #tpu.memory_space<vmem>>, vector<48x128xf32>
    %cst_17 = arith.constant dense<0.000000e+00> : vector<8x128xf32>
    %16 = tpu.matmul %14, %15, %cst_17 {dimension_numbers = #tpu.dot_dimension_numbers<[1], [0], [0], [1], [0, 0, 1, 1], [], []>} : vector<8x48xf32>, vector<48x128xf32>, vector<8x128xf32> -> vector<8x128xf32>
    %c0_18 = arith.constant 0 : index
    %c0_19 = arith.constant 0 : index
    %17 = vector.load %arg8[%c0_18, %c0_19] : memref<1x128xf32, #tpu.memory_space<vmem>>, vector<1x128xf32>
    %18 = vector.broadcast %17 : vector<1x128xf32> to vector<8x128xf32>
    %19 = arith.addf %16, %18 : vector<8x128xf32>
    %cst_20 = arith.constant 0.000000e+00 : f32
    %20 = vector.broadcast %cst_20 : f32 to vector<8x128xf32>
    %21 = arith.maximumf %19, %20 : vector<8x128xf32>
    %c0_21 = arith.constant 0 : index
    %c0_22 = arith.constant 0 : index
    %22 = vector.load %arg9[%c0_21, %c0_22] : memref<128x16xf32, #tpu.memory_space<vmem>>, vector<128x16xf32>
    %cst_23 = arith.constant dense<0.000000e+00> : vector<8x16xf32>
    %23 = tpu.matmul %21, %22, %cst_23 {dimension_numbers = #tpu.dot_dimension_numbers<[1], [0], [0], [1], [0, 0, 1, 1], [], []>} : vector<8x128xf32>, vector<128x16xf32>, vector<8x16xf32> -> vector<8x16xf32>
    %c0_24 = arith.constant 0 : index
    %c0_25 = arith.constant 0 : index
    %24 = vector.load %arg10[%c0_24, %c0_25] : memref<1x16xf32, #tpu.memory_space<vmem>>, vector<1x16xf32>
    %25 = vector.broadcast %24 : vector<1x16xf32> to vector<8x16xf32>
    %26 = arith.addf %23, %25 : vector<8x16xf32>
    %c0_26 = arith.constant 0 : index
    %c0_27 = arith.constant 0 : index
    %27 = vector.load %arg12[%c0_26, %c0_27] : memref<8x16xf32, #tpu.memory_space<vmem>>, vector<8x16xf32>
    tpu.vector_store %arg12[%c0_26, %c0_27], %26 {strides = array<i32>} : memref<8x16xf32, #tpu.memory_space<vmem>>, vector<8x16xf32>,
    return
  }
  func.func @transform_0(%arg0: i32) -> (i32, i32) {
    %c0_i32 = arith.constant 0 : i32
    %c0_i32_0 = arith.constant 0 : i32
    return %arg0, %c0_i32 : i32, i32
  }
  func.func @transform_1(%arg0: i32) -> (i32, i32) {
    %c0_i32 = arith.constant 0 : i32
    %c0_i32_0 = arith.constant 0 : i32
    return %arg0, %c0_i32 : i32, i32
  }
  func.func @transform_2(%arg0: i32) -> (i32, i32) {
    %c0_i32 = arith.constant 0 : i32
    %c0_i32_0 = arith.constant 0 : i32
    %c0_i32_1 = arith.constant 0 : i32
    return %c0_i32, %c0_i32_0 : i32, i32
  }
  func.func @transform_3(%arg0: i32) -> (i32, i32) {
    %c0_i32 = arith.constant 0 : i32
    %c0_i32_0 = arith.constant 0 : i32
    %c0_i32_1 = arith.constant 0 : i32
    return %c0_i32, %c0_i32_0 : i32, i32
  }
  func.func @transform_4(%arg0: i32) -> (i32, i32) {
    %c0_i32 = arith.constant 0 : i32
    %c0_i32_0 = arith.constant 0 : i32
    %c0_i32_1 = arith.constant 0 : i32
    return %c0_i32, %c0_i32_0 : i32, i32
  }
  func.func @transform_5(%arg0: i32) -> (i32, i32) {
    %c0_i32 = arith.constant 0 : i32
    %c0_i32_0 = arith.constant 0 : i32
    %c0_i32_1 = arith.constant 0 : i32
    return %c0_i32, %c0_i32_0 : i32, i32
  }
  func.func @transform_6(%arg0: i32) -> (i32, i32) {
    %c0_i32 = arith.constant 0 : i32
    %c0_i32_0 = arith.constant 0 : i32
    %c0_i32_1 = arith.constant 0 : i32
    return %c0_i32, %c0_i32_0 : i32, i32
  }
  func.func @transform_7(%arg0: i32) -> (i32, i32) {
    %c0_i32 = arith.constant 0 : i32
    %c0_i32_0 = arith.constant 0 : i32
    %c0_i32_1 = arith.constant 0 : i32
    return %c0_i32, %c0_i32_0 : i32, i32
  }
  func.func @transform_8(%arg0: i32) -> (i32, i32) {
    %c0_i32 = arith.constant 0 : i32
    %c0_i32_0 = arith.constant 0 : i32
    %c0_i32_1 = arith.constant 0 : i32
    return %c0_i32, %c0_i32_0 : i32, i32
  }
  func.func @transform_9(%arg0: i32) -> (i32, i32) {
    %c0_i32 = arith.constant 0 : i32
    %c0_i32_0 = arith.constant 0 : i32
    %c0_i32_1 = arith.constant 0 : i32
    return %c0_i32, %c0_i32_0 : i32, i32
  }
  func.func @transform_10(%arg0: i32) -> (i32, i32) {
    %c0_i32 = arith.constant 0 : i32
    %c0_i32_0 = arith.constant 0 : i32
    return %arg0, %c0_i32 : i32, i32
  }
  func.func @transform_11(%arg0: i32) -> (i32, i32) {
    %c0_i32 = arith.constant 0 : i32
    %c0_i32_0 = arith.constant 0 : i32
    return %arg0, %c0_i32 : i32, i32
  }
}

</mosaic_0001>

<bundles_post_ra>
// kernel: a_call__.1
= control target key start
LH: loop header
LB: loop body
LE: loop exit
PB: predicated region body
PF: predicated region fallthrough
CT: control target
= control target key end

     0   :  { %17 = vsyncpa [#allocation3], 0  ;;  %s1153_s0 = inlined_call_operand.hbm [shape: f32[8,32], index: 0, kind: input, shape index: {}]   ;;  %s1154_s1 = inlined_call_operand.hbm [shape: f32[8,48], index: 1, kind: input, shape index: {}]   ;;  %s1155_s2 = inlined_call_operand.hbm [shape: f32[32,128], index: 2, kind: input, shape index: {}]   ;;  %s1156_s3 = inlined_call_operand.vmem [shape: f32[1,128], index: 3, kind: input, shape index: {}]   ;;  %s1157_s4 = inlined_call_operand.hbm [shape: f32[128,16], index: 4, kind: input, shape index: {}]   ;;  %s1158_s5 = inlined_call_operand.vmem [shape: f32[1,16], index: 5, kind: input, shape index: {}]   ;;  %s1159_s6 = inlined_call_operand.hbm [shape: f32[48,128], index: 6, kind: input, shape index: {}]   ;;  %s1160_s7 = inlined_call_operand.vmem [shape: f32[1,128], index: 7, kind: input, shape index: {}]   ;;  %s1161_s8 = inlined_call_operand.hbm [shape: f32[128,16], index: 8, kind: input, shape index: {}]   ;;  %s1162_s9 = inlined_call_operand.vmem [shape: f32[1,16], index: 9, kind: input, shape index: {}]   ;;  %s1163_s10 = inlined_call_operand.hbm [shape: f32[8,16], index: 10, kind: output, shape index: {0}]   ;;  %s1164_s11 = inlined_call_operand.hbm [shape: f32[8,16], index: 11, kind: output, shape index: {1}]  }
   0x1   :  { %18 = vsyncpa [#allocation6], 0 }
   0x2   :  { %19 = vsyncpa [#allocation9], 0 }
   0x3   :  { %20 = vsyncpa [#allocation12], 0 }
   0x4   :  { %21 = vsyncpa [#allocation4], 0 }
   0x5   :  { %22 = vsyncpa [#allocation15], 0  ;;  %s926_s17 = smov [#allocation5]   ;;  %s738_s21 = scalar_lea.hbm %s1154_s1, 128 }
   0x6   :  { %s39_s18 = sshll.u32 %s926_s17, 4  ;;  %p739_p0 = scmp.ne.s32.totalorder %s1154_s1, %s738_s21  ;;  %s40_s18 = int_to_ptr.vmem [resolvable:$true] %s39_s18 }
   0x7   :  { %p742_p1 = scmp.lt.u32.totalorder %s738_s21, %s1154_s1 }
   0x9   :  { %p744_p2 = pnand %p742_p1, %p739_p0 }
   0xb   :  { %747 = shalt.err (!%p744_p2)
}
   0xc   :  { %s748_s26 = scalar_lea.vmem %s40_s18, 128  ;;  %p753_p4 = scmp.lt.s32.totalorder %s40_s18, %s40_s18 }
   0xd   :  { %p749_p3 = scmp.ne.s32.totalorder %s40_s18, %s748_s26  ;;  %p754_p5 = scmp.lt.s32.totalorder %s748_s26, %s748_s26 }
   0xf   :  { %p755_p6 = por %p754_p5, %p753_p4 }
  0x11   :  { %p756_p7 = pnand %p755_p6, %p749_p3 }
  0x13   :  { %759 = shalt.err (!%p756_p7)
}
  0x14   :  { %42 = dma.hbm_to_vmem [thread:$0]  %s1154_s1, 128, %s40_s18, [#allocation6]  }
  0x15   :  { %s927_s29 = smov [#allocation8]   ;;  %s928_s12 = smov [#allocation2]  }
  0x16   :  { %s62_s30 = sshll.u32 %s927_s29, 4  ;;  %s29_s13 = sshll.u32 %s928_s12, 4  ;;  %s63_s30 = int_to_ptr.vmem [resolvable:$true] %s62_s30  ;;  %s30_s13 = int_to_ptr.vmem [resolvable:$true] %s29_s13 }
  0x17   :  { %s760_s16 = scalar_lea.hbm %s1157_s4, 2048 }
  0x18   :  { %p761_p8 = scmp.ne.s32.totalorder %s1157_s4, %s760_s16  ;;  %p764_p9 = scmp.lt.u32.totalorder %s760_s16, %s1157_s4 }
  0x1a   :  { %p766_p10 = pnand %p764_p9, %p761_p8 }
  0x1c   :  { %769 = shalt.err (!%p766_p10)
}
  0x1d   :  { %s770_s1 = scalar_lea.vmem %s63_s30, 2048  ;;  %p775_p12 = scmp.lt.s32.totalorder %s63_s30, %s63_s30 }
  0x1e   :  { %p771_p11 = scmp.ne.s32.totalorder %s63_s30, %s770_s1  ;;  %p776_p13 = scmp.lt.s32.totalorder %s770_s1, %s770_s1 }
  0x20   :  { %p777_p0 = por %p776_p13, %p775_p12 }
  0x22   :  { %p778_p1 = pnand %p777_p0, %p771_p11 }
  0x24   :  { %781 = shalt.err (!%p778_p1)
}
  0x25   :  { %s929_s18 = smov 128   ;;  %s930_s22 = smov 8  }
  0x26   :  { %68 = dma.hbm_to_vmem [thread:$0]  %s1157_s4, 2048, %s63_s30, [#allocation9], %s929_s18, %s929_s18, %s930_s22  }
  0x27   :  { %s782_s27 = scalar_lea.hbm %s1153_s0, 128 }
  0x28   :  { %p783_p2 = scmp.ne.s32.totalorder %s1153_s0, %s782_s27  ;;  %p786_p3 = scmp.lt.u32.totalorder %s782_s27, %s1153_s0 }
  0x2a   :  { %p788_p4 = pnand %p786_p3, %p783_p2 }
  0x2c   :  { %791 = shalt.err (!%p788_p4)
}
  0x2d   :  { %s792_s15 = scalar_lea.vmem %s30_s13, 128  ;;  %p797_p6 = scmp.lt.s32.totalorder %s30_s13, %s30_s13 }
  0x2e   :  { %p793_p5 = scmp.ne.s32.totalorder %s30_s13, %s792_s15  ;;  %p798_p7 = scmp.lt.s32.totalorder %s792_s15, %s792_s15 }
  0x30   :  { %p799_p8 = por %p798_p7, %p797_p6 }
  0x32   :  { %p800_p9 = pnand %p799_p8, %p793_p5 }
  0x34   :  { %803 = shalt.err (!%p800_p9)
}
  0x35   :  { %32 = dma.hbm_to_vmem [thread:$0]  %s1153_s0, 128, %s30_s13, [#allocation3]  }
  0x36   :  { %s931_s16 = smov [#allocation7]   ;;  %s932_s19 = smov [#allocation10]  }
  0x37   :  { %s48_s17 = sshll.u32 %s931_s16, 4  ;;  %s76_s20 = sshll.u32 %s932_s19, 4  ;;  %s49_s17 = int_to_ptr.vmem [resolvable:$true] %s48_s17  ;;  %s77_s20 = int_to_ptr.vmem [resolvable:$true] %s76_s20 }
  0x38   :  { %s804_s23 = scalar_lea.hbm %s1155_s2, 512 }
  0x39   :  { %p805_p10 = scmp.ne.s32.totalorder %s1155_s2, %s804_s23  ;;  %p808_p11 = scmp.lt.u32.totalorder %s804_s23, %s1155_s2 }
  0x3b   :  { %p810_p12 = pnand %p808_p11, %p805_p10 }
  0x3d   :  { %813 = shalt.err (!%p810_p12)
}
  0x3e   :  { %s814_s0 = scalar_lea.vmem %s49_s17, 512  ;;  %p819_p0 = scmp.lt.s32.totalorder %s49_s17, %s49_s17 }
  0x3f   :  { %p815_p13 = scmp.ne.s32.totalorder %s49_s17, %s814_s0  ;;  %p820_p1 = scmp.lt.s32.totalorder %s814_s0, %s814_s0 }
  0x41   :  { %p821_p2 = por %p820_p1, %p819_p0 }
  0x43   :  { %p822_p3 = pnand %p821_p2, %p815_p13 }
  0x45   :  { %825 = shalt.err (!%p822_p3)
}
  0x46   :  { %54 = dma.hbm_to_vmem [thread:$0]  %s1155_s2, 512, %s49_s17, [#allocation6], %s929_s18, %s929_s18, %s930_s22  }
  0x47   :  { %s826_s14 = scalar_lea.hbm %s1159_s6, 768 }
  0x48   :  { %p827_p4 = scmp.ne.s32.totalorder %s1159_s6, %s826_s14  ;;  %p830_p5 = scmp.lt.u32.totalorder %s826_s14, %s1159_s6 }
  0x4a   :  { %p832_p6 = pnand %p830_p5, %p827_p4 }
  0x4c   :  { %835 = shalt.err (!%p832_p6)
}
  0x4d   :  { %s836_s19 = scalar_lea.vmem %s77_s20, 768  ;;  %p841_p8 = scmp.lt.s32.totalorder %s77_s20, %s77_s20 }
  0x4e   :  { %p837_p7 = scmp.ne.s32.totalorder %s77_s20, %s836_s19  ;;  %p842_p9 = scmp.lt.s32.totalorder %s836_s19, %s836_s19 }
  0x50   :  { %p843_p10 = por %p842_p9, %p841_p8 }
  0x52   :  { %p844_p11 = pnand %p843_p10, %p837_p7 }
  0x54   :  { %847 = shalt.err (!%p844_p11)
}
  0x55   :  { %82 = dma.hbm_to_vmem [thread:$0]  %s1159_s6, 768, %s77_s20, [#allocation9], %s929_s18, %s929_s18, %s930_s22  }
  0x56   :  { %s933_s21 = smov [#allocation11]   ;;  %s848_s25 = scalar_lea.hbm %s1161_s8, 2048 }
  0x57   :  { %s90_s1 = sshll.u32 %s933_s21, 4  ;;  %p849_p12 = scmp.ne.s32.totalorder %s1161_s8, %s848_s25  ;;  %s91_s1 = int_to_ptr.vmem [resolvable:$true] %s90_s1 }
  0x58   :  { %p852_p13 = scmp.lt.u32.totalorder %s848_s25, %s1161_s8 }
  0x5a   :  { %p854_p0 = pnand %p852_p13, %p849_p12 }
  0x5c   :  { %857 = shalt.err (!%p854_p0)
}
  0x5d   :  { %s858_s28 = scalar_lea.vmem %s91_s1, 2048  ;;  %p863_p2 = scmp.lt.s32.totalorder %s91_s1, %s91_s1 }
  0x5e   :  { %p859_p1 = scmp.ne.s32.totalorder %s91_s1, %s858_s28  ;;  %p864_p3 = scmp.lt.s32.totalorder %s858_s28, %s858_s28 }
  0x60   :  { %p865_p4 = por %p864_p3, %p863_p2 }
  0x62   :  { %p866_p5 = pnand %p865_p4, %p859_p1 }
  0x64   :  { %869 = shalt.err (!%p866_p5)
}
  0x65   :  { %96 = dma.hbm_to_vmem [thread:$0]  %s1161_s8, 2048, %s91_s1, [#allocation12], %s929_s18, %s929_s18, %s930_s22  }
  0x66   :  { %914 = dma.done.wait [#allocation3], 128  }
  0x67   :  { %915 = vsyncadd [#allocation3], 4294967168 }
  0x68   :  { %916 = dma.done.wait [#allocation6], 640  }
  0x69   :  { %917 = vsyncadd [#allocation6], 4294966656 }
  0x6a   :  { %918 = dma.done.wait [#allocation9], 2816  }
  0x6b   :  { %919 = vsyncadd [#allocation9], 4294964480 }
  0x6c   :  { %920 = dma.done.wait [#allocation12], 2048  }
  0x6d   :  { %921 = vsyncadd [#allocation12], 4294965248  ;;  %v934_v0 = vmov 0.0|0.0   ;;  %vm935_vm0 = vmmov 0   ;;  %v936_v1 = vmov 0.0   ;;  %v300_v2 = vld [vmem:[#allocation10] sm:$0xff] }
  0x6e   :  { %692 = vmatprep.subr.bf16.mxu0 %v934_v0  ;;  %662 = vmatprep.subr.bf16.mxu1 %v934_v0  ;;  %v301_v3 = vld [vmem:[#allocation10 + $0x8] sm:$0xff]  ;;  %v118_v4 = vld [vmem:[#allocation7] sm:$0xff]  ;;  %v302_v7 = vld [vmem:[#allocation10 + $0x10] sm:$0xff]  ;;  %vm129_vm1 = vcmask 261120   ;;  %vm313_vm2 = vcmask 392192   ;;  %s937_s15 = smov [#allocation13]  }
  0x6f   :  { %574 = vmatprep.mubr.msk.f32.mxu1 %vm935_vm0, %v936_v1  ;;  %624 = vmatprep.mubr.msk.f32.mxu0 %vm935_vm0, %v936_v1  ;;  %v693_v5 = vpack.c.bf16 %v301_v3, %v300_v2  ;;  %v119_v6 = vld [vmem:[#allocation7 + $0x8] sm:$0xff]  ;;  %v303_v8 = vld [vmem:[#allocation10 + $0x18] sm:$0xff]  ;;  %v120_v10 = vld [vmem:[#allocation7 + $0x10] sm:$0xff]  ;;  %vm297_vm3 = vcmask 130048   ;;  %s938_s4 = smov [#allocation14]  }
  0x70   :  { %v663_v9 = vpack.c.bf16 %v119_v6, %v118_v4  ;;  %v121_v11 = vld [vmem:[#allocation7 + $0x18] sm:$0xff]  ;;  %v696_v12 = vpack.c.bf16 %v303_v8, %v302_v7  ;;  %v304_v14 = vld [vmem:[#allocation10 + $0x20] sm:$0xff]  ;;  %v305_v15 = vld [vmem:[#allocation10 + $0x28] sm:$0xff]  ;;  %s498_s30 = sshll.u32 %s938_s4, 4  ;;  %s1121_s30 = int_to_ptr.vmem [resolvable:$true] %s498_s30 }
  0x71   :  { %694 = vmatpush3.bf16.msra.mxu0 %v693_v5  ;;  %v666_v13 = vpack.c.bf16 %v121_v11, %v120_v10  ;;  %v204_v16 = vld [vmem:[#allocation8] sm:$0xff]  ;;  %v205_v17 = vld [vmem:[#allocation8 + $0x8] sm:$0xff]  ;;  %v699_v18 = vpack.c.bf16 %v305_v15, %v304_v14  ;;  %v117_v19 = vld [vmem:[#allocation2] sm:$0xff] }
  0x72   :  { %664 = vmatpush3.bf16.msra.mxu1 %v663_v9  ;;  %695 = vmatprep.subr.bf16.mxu0 %v934_v0  ;;  %v669_v20 = vpack.c.bf16 %v205_v17, %v204_v16  ;;  %v388_v21 = vld [vmem:[#allocation11] sm:$0xff]  ;;  %v389_v22 = vld [vmem:[#allocation11 + $0x8] sm:$0xff]  ;;  %v390_v28 = vld [vmem:[#allocation11 + $0x10] sm:$0xff] }
  0x73   :  { %665 = vmatprep.subr.bf16.mxu1 %v934_v0  ;;  %v206_v23 = vld [vmem:[#allocation8 + $0x10] sm:$0xff]  ;;  %v207_v24 = vld [vmem:[#allocation8 + $0x18] sm:$0xff]  ;;  %v702_v26 = vpack.c.bf16 %v389_v22, %v388_v21  ;;  %v391_v29 = vld [vmem:[#allocation11 + $0x18] sm:$0xff] }
  0x74   :  { %v299_v25 = vld [vmem:[#allocation5] sm:$0xff]  ;;  %v672_v27 = vpack.c.bf16 %v207_v24, %v206_v23  ;;  %v208_v30 = vld [vmem:[#allocation8 + $0x20] sm:$0xff]  ;;  %v209_v31 = vld [vmem:[#allocation8 + $0x28] sm:$0xff]  ;;  %v705_v32 = vpack.c.bf16 %v391_v29, %v390_v28 }
  0x75   :  { %697 = vmatpush3.bf16.msra.mxu0 %v696_v12  ;;  %v675_v33 = vpack.c.bf16 %v209_v31, %v208_v30  ;;  %v392_v34 = vld [vmem:[#allocation11 + $0x20] sm:$0xff]  ;;  %v393_v35 = vld [vmem:[#allocation11 + $0x28] sm:$0xff]  ;;  %v394_v40 = vld [vmem:[#allocation11 + $0x30] sm:$0xff] }
  0x76   :  { %667 = vmatpush3.bf16.msra.mxu1 %v666_v13  ;;  %698 = vmatprep.subr.bf16.mxu0 %v934_v0  ;;  %v210_v36 = vld [vmem:[#allocation8 + $0x30] sm:$0xff]  ;;  %v211_v37 = vld [vmem:[#allocation8 + $0x38] sm:$0xff]  ;;  %v708_v38 = vpack.c.bf16 %v393_v35, %v392_v34  ;;  %v395_v41 = vld [vmem:[#allocation11 + $0x38] sm:$0xff] }
  0x77   :  { %668 = vmatprep.subr.bf16.mxu1 %v934_v0  ;;  %v678_v39 = vpack.c.bf16 %v211_v37, %v210_v36  ;;  %v212_v42 = vld [vmem:[#allocation8 + $0x40] sm:$0xff]  ;;  %v213_v43 = vld [vmem:[#allocation8 + $0x48] sm:$0xff]  ;;  %v711_v44 = vpack.c.bf16 %v395_v41, %v394_v40  ;;  %v396_v46 = vld [vmem:[#allocation11 + $0x40] sm:$0xff] }
  0x78   :  { %v681_v45 = vpack.c.bf16 %v213_v43, %v212_v42  ;;  %v397_v47 = vld [vmem:[#allocation11 + $0x48] sm:$0xff]  ;;  %v214_v48 = vld [vmem:[#allocation8 + $0x50] sm:$0xff]  ;;  %v398_v52 = vld [vmem:[#allocation11 + $0x50] sm:$0xff] }
  0x79   :  { %700 = vmatpush3.bf16.msra.mxu0 %v699_v18  ;;  %575 = vmatmul.mubr.msk.f32.vlgmr.msra.gmra.mrb[0].mxu1 %vm129_vm1, %v117_v19  ;;  %v215_v49 = vld [vmem:[#allocation8 + $0x58] sm:$0xff]  ;;  %v714_v50 = vpack.c.bf16 %v397_v47, %v396_v46  ;;  %v399_v53 = vld [vmem:[#allocation11 + $0x58] sm:$0xff]  ;;  %v216_v54 = vld [vmem:[#allocation8 + $0x60] sm:$0xff] }
  0x7a   :  { %670 = vmatpush3.bf16.msra.mxu1 %v669_v20  ;;  %701 = vmatprep.subr.bf16.mxu0 %v934_v0  ;;  %v684_v51 = vpack.c.bf16 %v215_v49, %v214_v48  ;;  %v217_v55 = vld [vmem:[#allocation8 + $0x68] sm:$0xff]  ;;  %v717_v56 = vpack.c.bf16 %v399_v53, %v398_v52  ;;  %v400_v58 = vld [vmem:[#allocation11 + $0x60] sm:$0xff]  ;;  %v401_v59 = vld [vmem:[#allocation11 + $0x68] sm:$0xff] }
  0x7b   :  { %671 = vmatprep.subr.bf16.mxu1 %v934_v0  ;;  %609 = vmatprep.mubr.msk.f32.mxu1 %vm935_vm0, %v936_v1  ;;  %v687_v57 = vpack.c.bf16 %v217_v55, %v216_v54  ;;  %v720_v60 = vpack.c.bf16 %v401_v59, %v400_v58  ;;  %v218_v61 = vld [vmem:[#allocation8 + $0x70] sm:$0xff]  ;;  %v219_v62 = vld [vmem:[#allocation8 + $0x78] sm:$0xff]  ;;  %v403_v2 = vld [vmem:[#allocation11 + $0x78] sm:$0xff] }
  0x7c   :  { %625 = vmatmul.mubr.msk.f32.vlgmr.msra.gmra.mrb[0].mxu0 %vm313_vm2, %v299_v25  ;;  %v690_v63 = vpack.c.bf16 %v219_v62, %v218_v61  ;;  %v514_v4 = vld [vmem:[%s1156_s3] ss:$0 sm:$0xff]  ;;  %s488_s3 = sshll.u32 %s937_s15, 4  ;;  %s489_s3 = int_to_ptr.vmem [resolvable:$true] %s488_s3 }
  0x7d   :  { %703 = vmatpush3.bf16.msra.mxu0 %v702_v26  ;;  %659 = vmatprep.mubr.msk.f32.mxu0 %vm935_vm0, %v936_v1  ;;  %v402_v1 = vld [vmem:[#allocation11 + $0x70] sm:$0xff]  ;;  %v517_v8 = vld [vmem:[%s1160_s7] ss:$0 sm:$0xff]  ;;  %p875_p7 = scmp.lt.s32.totalorder %s489_s3, %s489_s3 }
  0x7e   :  { %673 = vmatpush3.bf16.msra.mxu1 %v672_v27  ;;  %704 = vmatprep.subr.bf16.mxu0 %v934_v0  ;;  %v723_v3 = vpack.c.bf16 %v403_v2, %v402_v1  ;;  %v516_v13 = vld [vmem:[%s1158_s5] ss:$0 sm:$0xff]  ;;  %s870_s5 = scalar_lea.vmem %s489_s3, 128 }
  0x7f   :  { %674 = vmatprep.subr.bf16.mxu1 %v934_v0  ;;  %v519_v17 = vld [vmem:[%s1162_s9] ss:$0 sm:$0xff]  ;;  %p871_p6 = scmp.ne.s32.totalorder %s489_s3, %s870_s5  ;;  %p876_p8 = scmp.lt.s32.totalorder %s870_s5, %s870_s5 }
  0x81   :  { %706 = vmatpush3.bf16.msra.mxu0 %v705_v32  ;;  %p877_p9 = por %p876_p8, %p875_p7 }
  0x82   :  { %676 = vmatpush3.bf16.msra.mxu1 %v675_v33  ;;  %707 = vmatprep.subr.bf16.mxu0 %v934_v0 }
  0x83   :  { %677 = vmatprep.subr.bf16.mxu1 %v934_v0  ;;  %p878_p10 = pnand %p877_p9, %p871_p6 }
  0x85   :  { %709 = vmatpush3.bf16.msra.mxu0 %v708_v38 }
  0x86   :  { %679 = vmatpush3.bf16.msra.mxu1 %v678_v39  ;;  %710 = vmatprep.subr.bf16.mxu0 %v934_v0 }
  0x87   :  { %680 = vmatprep.subr.bf16.mxu1 %v934_v0 }
  0x89   :  { %712 = vmatpush3.bf16.msra.mxu0 %v711_v44 }
  0x8a   :  { %682 = vmatpush3.bf16.msra.mxu1 %v681_v45  ;;  %713 = vmatprep.subr.bf16.mxu0 %v934_v0 }
  0x8b   :  { %683 = vmatprep.subr.bf16.mxu1 %v934_v0 }
  0x8d   :  { %715 = vmatpush3.bf16.msra.mxu0 %v714_v50 }
  0x8e   :  { %685 = vmatpush3.bf16.msra.mxu1 %v684_v51  ;;  %716 = vmatprep.subr.bf16.mxu0 %v934_v0 }
  0x8f   :  { %686 = vmatprep.subr.bf16.mxu1 %v934_v0 }
  0x91   :  { %718 = vmatpush3.bf16.msra.mxu0 %v717_v56 }
  0x92   :  { %688 = vmatpush3.bf16.msra.mxu1 %v687_v57  ;;  %719 = vmatprep.subr.bf16.mxu0 %v934_v0 }
  0x93   :  { %689 = vmatprep.subr.bf16.mxu1 %v934_v0 }
  0x95   :  { %721 = vmatpush3.bf16.msra.mxu0 %v720_v60 }
  0x96   :  { %722 = vmatprep.subr.bf16.mxu0 %v934_v0  ;;  %691 = vmatpush3.bf16.msra.mxu1 %v690_v63 }
  0x99   :  { %724 = vmatpush3.bf16.msra.mxu0 %v723_v3 }
 0x14c   :  { %v199_v5 = vpop.f32.mrb[0].mxu1 }
 0x14d   :  { %v200_v6 = vadd.f32 %v514_v4, %v199_v5  ;;  %v576_v7 = vpop.f32.mrb[1].mxu1 }
 0x14f   :  { %v203_v0 = vmax.f32 %v200_v6, 0.0  ;;  %v383_v9 = vpop.f32.mrb[0].mxu0 }
 0x150   :  { %v384_v10 = vadd.f32 %v517_v8, %v383_v9  ;;  %v626_v11 = vpop.f32.mrb[1].mxu0 }
 0x151   :  { %610 = vmatmul.mubr.f32.vlgmr.msra.gmra.mrb[2].mxu1 %v203_v0 }
 0x152   :  { %v387_v12 = vmax.f32 %v384_v10, 0.0 }
 0x154   :  { %660 = vmatmul.mubr.f32.vlgmr.msra.gmra.mrb[2].mxu0 %v387_v12 }
 0x224   :  { %v293_v14 = vpop.f32.mrb[2].mxu1 }
 0x225   :  { %v294_v15 = vadd.f32 %v516_v13, %v293_v14  ;;  %v611_v16 = vpop.f32.mrb[3].mxu1 }
 0x227   :  { %v477_v18 = vpop.f32.mrb[2].mxu0  ;;  %298 = vst.msk [vmem:[#allocation13] sm:$0xff] %vm297_vm3, %v294_v15 }
 0x228   :  { %v478_v19 = vadd.f32 %v519_v17, %v477_v18  ;;  %v661_v20 = vpop.f32.mrb[3].mxu0 }
 0x229   :  { %881 = shalt.err (!%p878_p10)
}
 0x22a   :  { %s882_s17 = scalar_lea.hbm %s1163_s10, 128 }
 0x22b   :  { %p883_p11 = scmp.ne.s32.totalorder %s1163_s10, %s882_s17  ;;  %p886_p12 = scmp.lt.u32.totalorder %s882_s17, %s1163_s10 }
 0x22d   :  { %p888_p13 = pnand %p886_p12, %p883_p11 }
 0x22f   :  { %891 = shalt.err (!%p888_p13)
}
 0x230   :  { %491 = dma.vmem_to_hbm [thread:$0]  %s489_s3, 128, %s1163_s10, [#allocation4]   ;;  %481 = vst.msk [vmem:[#allocation14] sm:$0xff] %vm297_vm3, %v478_v19 }
 0x231   :  { %s892_s26 = scalar_lea.vmem %s1121_s30, 128  ;;  %p897_p1 = scmp.lt.s32.totalorder %s1121_s30, %s1121_s30 }
 0x232   :  { %p893_p0 = scmp.ne.s32.totalorder %s1121_s30, %s892_s26  ;;  %p898_p2 = scmp.lt.s32.totalorder %s892_s26, %s892_s26 }
 0x234   :  { %p899_p3 = por %p898_p2, %p897_p1 }
 0x236   :  { %p900_p4 = pnand %p899_p3, %p893_p0 }
 0x238   :  { %903 = shalt.err (!%p900_p4)
}
 0x239   :  { %s904_s13 = scalar_lea.hbm %s1164_s11, 128 }
 0x23a   :  { %p905_p5 = scmp.ne.s32.totalorder %s1164_s11, %s904_s13  ;;  %p908_p6 = scmp.lt.u32.totalorder %s904_s13, %s1164_s11 }
 0x23c   :  { %p910_p7 = pnand %p908_p6, %p905_p5 }
 0x23e   :  { %913 = shalt.err (!%p910_p7)
}
 0x23f   :  { %501 = dma.vmem_to_hbm [thread:$0]  %s1121_s30, 128, %s1164_s11, [#allocation15]  }
 0x240   :  { %922 = dma.done.wait [#allocation4], 128  }
 0x241   :  { %923 = vsyncadd [#allocation4], 4294967168 }
 0x242   :  { %924 = dma.done.wait [#allocation15], 128  }
 0x243   :  { %925 = vsyncadd [#allocation15], 4294967168 }
 0x244   :  { %508 = vsyncpa [#allocation3], 1 }
 0x245   :  { %509 = vsyncpa [#allocation6], 1 }
 0x246   :  { %510 = vsyncpa [#allocation9], 1 }
 0x247   :  { %511 = vsyncpa [#allocation12], 1 }
 0x248   :  { %512 = vsyncpa [#allocation4], 1 }
 0x249   :  { %513 = vsyncpa [#allocation15], 1 }

</bundles_post_ra>
